<compile_context>
chip_gen: v7x
topology: tpu7x:2x2x1
jax: 0.10.0
libtpu: 0.0.40
codegen_flags: <defaults>
</compile_context>

<pallas_src>
import jax
import jax.numpy as jnp
from jax.experimental import pallas as pl
from jax.experimental.pallas import tpu as pltpu


def _round_up(x, m):
    return ((x + m - 1) // m) * m


def _testnet_kernel(x_ref, w1_ref, b1_ref, w2_ref, b2_ref, o_ref):
    # dense1: bf16 operands, f32 accumulation on the MXU; bias + ReLU in f32.
    h = jnp.dot(x_ref[...], w1_ref[...], preferred_element_type=jnp.float32)
    h = jnp.maximum(h + b1_ref[...], 0.0)                  # (tb, 128) + (1, 128)

    # dense2 -> (tb, out_feats) logits; bias in f32.
    logits = jnp.dot(h.astype(w2_ref.dtype), w2_ref[...],
                     preferred_element_type=jnp.float32)
    logits = logits + b2_ref[...]                          # (tb, out) + (1, out)

    # Numerically stable softmax over the last (lane) axis, all f32.
    m = jnp.max(logits, axis=-1, keepdims=True)
    e = jnp.exp(logits - m)
    s = jnp.sum(e, axis=-1, keepdims=True)
    inv = pl.reciprocal(s, approx=True)
    inv = inv * (2.0 - s * inv)        # one Newton-Raphson step -> ~f32 accuracy
    o_ref[...] = (e * inv).astype(o_ref.dtype)


def _pick_tb(B, block_b):
    """Batch tile: as large as block_b, but keep >= 2 grid steps for moderate B so the
    'parallel' batch axis can be sharded across both v7x TensorCores."""
    if B >= 2 * block_b:
        return block_b
    half = _round_up(max(1, -(-B // 2)), 8)   # cdiv(B, 2), rounded to sublane multiple
    return max(8, min(block_b, half))


def testnet_forward(x, w1, b1, w2, b2, *, block_b=512):
    """x: (B, in_feats); w1: (in_feats, 128); b1: (128,); w2: (128, out); b2: (out,).
    Weights are stored as (in, out) == PyTorch W.T, so the kernel computes x @ W + b."""
    B, in_feats = x.shape
    hidden = w1.shape[1]
    out_feats = w2.shape[1]

    # bf16 matmul operands (accumulation forced to f32 inside the kernel); biases stay f32.
    x_bf = x.astype(jnp.bfloat16)
    w1_bf = w1.astype(jnp.bfloat16)
    w2_bf = w2.astype(jnp.bfloat16)
    b1_2d = b1.reshape(1, hidden).astype(jnp.float32)
    b2_2d = b2.reshape(1, out_feats).astype(jnp.float32)

    tb = _pick_tb(B, block_b)
    # Ragged last block: rows past B hold unspecified data, but softmax is row-independent
    # and OOB rows are never written back, so this is safe and avoids an explicit pad pass.
    grid = (pl.cdiv(B, tb),)

    cost = pl.CostEstimate(
        flops=2 * B * (in_feats * hidden + hidden * out_feats),
        transcendentals=B * (out_feats + 1),
        bytes_accessed=(x_bf.size * 2 + w1_bf.size * 2 + w2_bf.size * 2
                        + b1_2d.size * 4 + b2_2d.size * 4 + B * out_feats * 4),
    )

    return pl.pallas_call(
        _testnet_kernel,
        out_shape=jax.ShapeDtypeStruct((B, out_feats), jnp.float32),
        grid_spec=pl.GridSpec(
            grid=grid,
            in_specs=[
                # batch-tiled activations, unpadded feature axis (block dim == array dim)
                pl.BlockSpec((tb, in_feats), lambda i: (i, 0)),
                # weights / biases: full-array blocks, resident in VMEM across all steps
                pl.BlockSpec((in_feats, hidden), lambda i: (0, 0)),
                pl.BlockSpec((1, hidden), lambda i: (0, 0)),
                pl.BlockSpec((hidden, out_feats), lambda i: (0, 0)),
                pl.BlockSpec((1, out_feats), lambda i: (0, 0)),
            ],
            out_specs=pl.BlockSpec((tb, out_feats), lambda i: (i, 0)),
        ),
        compiler_params=pltpu.CompilerParams(
            # batch tiles are independent -> v7x can shard them over its 2 TensorCores
            dimension_semantics=("parallel",)),
        cost_estimate=cost,
    )(x_bf, w1_bf, b1_2d, w2_bf, b2_2d)


if __name__ == "__main__":
    # Small, MNIST-like-but-tiny shapes: batch=8, in_feats=32, hidden=128 (fixed by the
    # module), out_feats=16.
    B, IN_FEATS, HIDDEN, OUT_FEATS = 8, 32, 128, 16

    key = jax.random.PRNGKey(0)
    kx, kw1, kb1, kw2, kb2 = jax.random.split(key, 5)

    x = jax.random.normal(kx, (B, IN_FEATS), dtype=jnp.float32)
    # Deterministic "Linear"-style init (scaled normals); stored as (in, out).
    w1 = jax.random.normal(kw1, (IN_FEATS, HIDDEN), dtype=jnp.float32) * (1.0 / jnp.sqrt(IN_FEATS))
    b1 = jax.random.normal(kb1, (HIDDEN,), dtype=jnp.float32) * 0.01
    w2 = jax.random.normal(kw2, (HIDDEN, OUT_FEATS), dtype=jnp.float32) * (1.0 / jnp.sqrt(HIDDEN))
    b2 = jax.random.normal(kb2, (OUT_FEATS,), dtype=jnp.float32) * 0.01

    out = testnet_forward(x, w1, b1, w2, b2)
    out = jax.block_until_ready(out)

    # Sanity check against a plain-JAX f32 reference. Kernel uses bf16 matmul operands
    # (f32 accumulation), so the tolerance is relaxed accordingly.
    h_ref = jnp.maximum(x @ w1 + b1, 0.0)
    ref = jax.nn.softmax(h_ref @ w2 + b2, axis=-1)
    assert out.shape == (B, OUT_FEATS)
    assert jnp.allclose(out, ref, atol=2e-2, rtol=2e-2), float(jnp.max(jnp.abs(out - ref)))
    # Softmax normalization itself is done in f32 -> rows still sum to 1 tightly.
    assert jnp.allclose(jnp.sum(out, axis=-1), 1.0, atol=1e-5)

    print("KERNEL_OK")
</pallas_src>

<mosaic_0001>
module attributes {stable_mosaic.version = 11 : i64} {
  func.func @_testnet_kernel(%arg0: i32, %arg1: memref<8x32xbf16, #tpu.memory_space<vmem>>, %arg2: memref<32x128xbf16, #tpu.memory_space<vmem>>, %arg3: memref<1x128xf32, #tpu.memory_space<vmem>>, %arg4: memref<128x16xbf16, #tpu.memory_space<vmem>>, %arg5: memref<1x16xf32, #tpu.memory_space<vmem>>, %arg6: memref<8x16xf32, #tpu.memory_space<vmem>>) attributes {dimension_semantics = [#tpu.dimension_semantics<parallel>], iteration_bounds = array<i64: 1>, scalar_prefetch = 0 : i64, scratch_operands = 0 : i64, tpu.core_type = #tpu.core_type<tc>, window_params = [{transform_indices = @transform_0, window_bounds = array<i64: 8, 32>}, {pipeline_mode = #tpu.pipeline_mode<synchronous>, transform_indices = @transform_1, window_bounds = array<i64: 32, 128>}, {pipeline_mode = #tpu.pipeline_mode<synchronous>, transform_indices = @transform_2, window_bounds = array<i64: 1, 128>}, {pipeline_mode = #tpu.pipeline_mode<synchronous>, transform_indices = @transform_3, window_bounds = array<i64: 128, 16>}, {pipeline_mode = #tpu.pipeline_mode<synchronous>, transform_indices = @transform_4, window_bounds = array<i64: 1, 16>}, {transform_indices = @transform_5, window_bounds = array<i64: 8, 16>}]} {
    %c0 = arith.constant 0 : index
    %c0_0 = arith.constant 0 : index
    %0 = vector.load %arg1[%c0, %c0_0] : memref<8x32xbf16, #tpu.memory_space<vmem>>, vector<8x32xbf16>
    %c0_1 = arith.constant 0 : index
    %c0_2 = arith.constant 0 : index
    %1 = vector.load %arg2[%c0_1, %c0_2] : memref<32x128xbf16, #tpu.memory_space<vmem>>, vector<32x128xbf16>
    %cst = arith.constant dense<0.000000e+00> : vector<8x128xf32>
    %2 = tpu.matmul %0, %1, %cst {dimension_numbers = #tpu.dot_dimension_numbers<[1], [0], [0], [1], [0, 0, 1, 1], [], []>} : vector<8x32xbf16>, vector<32x128xbf16>, vector<8x128xf32> -> vector<8x128xf32>
    %c0_3 = arith.constant 0 : index
    %c0_4 = arith.constant 0 : index
    %3 = vector.load %arg3[%c0_3, %c0_4] : memref<1x128xf32, #tpu.memory_space<vmem>>, vector<1x128xf32>
    %4 = vector.broadcast %3 : vector<1x128xf32> to vector<8x128xf32>
    %5 = arith.addf %2, %4 : vector<8x128xf32>
    %cst_5 = arith.constant 0.000000e+00 : f32
    %6 = vector.broadcast %cst_5 : f32 to vector<8x128xf32>
    %7 = arith.maximumf %5, %6 : vector<8x128xf32>
    %8 = arith.truncf %7 : vector<8x128xf32> to vector<8x128xbf16>
    %c0_6 = arith.constant 0 : index
    %c0_7 = arith.constant 0 : index
    %9 = vector.load %arg4[%c0_6, %c0_7] : memref<128x16xbf16, #tpu.memory_space<vmem>>, vector<128x16xbf16>
    %cst_8 = arith.constant dense<0.000000e+00> : vector<8x16xf32>
    %10 = tpu.matmul %8, %9, %cst_8 {dimension_numbers = #tpu.dot_dimension_numbers<[1], [0], [0], [1], [0, 0, 1, 1], [], []>} : vector<8x128xbf16>, vector<128x16xbf16>, vector<8x16xf32> -> vector<8x16xf32>
    %c0_9 = arith.constant 0 : index
    %c0_10 = arith.constant 0 : index
    %11 = vector.load %arg5[%c0_9, %c0_10] : memref<1x16xf32, #tpu.memory_space<vmem>>, vector<1x16xf32>
    %12 = vector.broadcast %11 : vector<1x16xf32> to vector<8x16xf32>
    %13 = arith.addf %10, %12 : vector<8x16xf32>
    %cst_11 = arith.constant dense<0xFF800000> : vector<8xf32>
    %14 = vector.multi_reduction <maximumf>, %13, %cst_11 [1] : vector<8x16xf32> to vector<8xf32>
    %15 = vector.shape_cast %14 : vector<8xf32> to vector<8x1xf32>
    %16 = vector.broadcast %15 : vector<8x1xf32> to vector<8x16xf32>
    %17 = arith.subf %13, %16 : vector<8x16xf32>
    %18 = math.exp %17 : vector<8x16xf32>
    %cst_12 = arith.constant dense<0.000000e+00> : vector<8xf32>
    %19 = vector.multi_reduction <add>, %18, %cst_12 [1] : vector<8x16xf32> to vector<8xf32>
    %20 = vector.shape_cast %19 : vector<8xf32> to vector<8x1xf32>
    %21 = tpu.reciprocal %20 {approx = true} : vector<8x1xf32> -> vector<8x1xf32>
    %22 = arith.mulf %20, %21 : vector<8x1xf32>
    %cst_13 = arith.constant 2.000000e+00 : f32
    %23 = vector.broadcast %cst_13 : f32 to vector<8x1xf32>
    %24 = arith.subf %23, %22 : vector<8x1xf32>
    %25 = arith.mulf %21, %24 : vector<8x1xf32>
    %26 = vector.broadcast %25 : vector<8x1xf32> to vector<8x16xf32>
    %27 = arith.mulf %18, %26 : vector<8x16xf32>
    %c0_14 = arith.constant 0 : index
    %c0_15 = arith.constant 0 : index
    %28 = vector.load %arg6[%c0_14, %c0_15] : memref<8x16xf32, #tpu.memory_space<vmem>>, vector<8x16xf32>
    tpu.vector_store %arg6[%c0_14, %c0_15], %27 {strides = array<i32>} : memref<8x16xf32, #tpu.memory_space<vmem>>, vector<8x16xf32>,
    return
  }
  func.func @transform_0(%arg0: i32) -> (i32, i32) {
    %c0_i32 = arith.constant 0 : i32
    %c0_i32_0 = arith.constant 0 : i32
    return %arg0, %c0_i32 : i32, i32
  }
  func.func @transform_1(%arg0: i32) -> (i32, i32) {
    %c0_i32 = arith.constant 0 : i32
    %c0_i32_0 = arith.constant 0 : i32
    %c0_i32_1 = arith.constant 0 : i32
    return %c0_i32, %c0_i32_0 : i32, i32
  }
  func.func @transform_2(%arg0: i32) -> (i32, i32) {
    %c0_i32 = arith.constant 0 : i32
    %c0_i32_0 = arith.constant 0 : i32
    %c0_i32_1 = arith.constant 0 : i32
    return %c0_i32, %c0_i32_0 : i32, i32
  }
  func.func @transform_3(%arg0: i32) -> (i32, i32) {
    %c0_i32 = arith.constant 0 : i32
    %c0_i32_0 = arith.constant 0 : i32
    %c0_i32_1 = arith.constant 0 : i32
    return %c0_i32, %c0_i32_0 : i32, i32
  }
  func.func @transform_4(%arg0: i32) -> (i32, i32) {
    %c0_i32 = arith.constant 0 : i32
    %c0_i32_0 = arith.constant 0 : i32
    %c0_i32_1 = arith.constant 0 : i32
    return %c0_i32, %c0_i32_0 : i32, i32
  }
  func.func @transform_5(%arg0: i32) -> (i32, i32) {
    %c0_i32 = arith.constant 0 : i32
    %c0_i32_0 = arith.constant 0 : i32
    return %arg0, %c0_i32 : i32, i32
  }
}

</mosaic_0001>

<bundles_post_ra>
// kernel: tpu_custom_call.1
= control target key start
LH: loop header
LB: loop body
LE: loop exit
PB: predicated region body
PF: predicated region fallthrough
CT: control target
= control target key end

     0   :  { %v327_v1 = vmov 0.0   ;;  %vm328_vm0 = vmmov 0   ;;  %vm46_vm1 = vcmask 261120   ;;  %s414_s0 = inlined_call_operand.vmem [shape: bf16[8,32], index: 0, kind: input, shape index: {}]   ;;  %s415_s1 = inlined_call_operand.vmem [shape: bf16[32,128], index: 1, kind: input, shape index: {}]   ;;  %s416_s2 = inlined_call_operand.vmem [shape: f32[1,128], index: 2, kind: input, shape index: {}]   ;;  %s417_s3 = inlined_call_operand.vmem [shape: bf16[128,16], index: 3, kind: input, shape index: {}]   ;;  %s418_s4 = inlined_call_operand.vmem [shape: f32[1,16], index: 4, kind: input, shape index: {}]   ;;  %s419_s5 = inlined_call_operand.hbm [shape: f32[8,16], index: 5, kind: output, shape index: {}]  }
   0x1   :  { %v289_v0 = vld [vmem:[%s415_s1] sm:$0xff]   ;;  %258 = vmatprep.subr.bf16.mxu0 %v327_v1  ;;  %266 = vmatprep.subr.bf16.mxu1 %v327_v1  ;;  %v290_v2 = vld [vmem:[%s415_s1 + $0x8] sm:$0xff]   ;;  %v293_v6 = vld [vmem:[%s417_s3 + $0x10] sm:$0xff]  }
   0x2   :  { %259 = vmatpush3.bf16.msra.mxu0 %v289_v0  ;;  %262 = vmatprep.mubr.msk.bf16.mxu0 %vm328_vm0, %v327_v1  ;;  %v291_v3 = vld [vmem:[%s417_s3] sm:$0xff]   ;;  %v292_v4 = vld [vmem:[%s417_s3 + $0x8] sm:$0xff]  }
   0x3   :  { %260 = vmatprep.subr.bf16.mxu0 %v327_v1  ;;  %282 = vmatprep.mubr.msk.bf16.mxu1 %vm328_vm0, %v327_v1  ;;  %v22_v5 = vld [vmem:[%s414_s0] sm:$0xf] }
   0x4   :  { %267 = vmatpush3.bf16.msra.mxu1 %v291_v3 }
   0x5   :  { %268 = vmatprep.subr.bf16.mxu1 %v327_v1 }
   0x6   :  { %261 = vmatpush3.bf16.msra.mxu0 %v290_v2 }
   0x8   :  { %269 = vmatpush3.bf16.msra.mxu1 %v292_v4 }
   0x9   :  { %263 = vmatmul.mubr.msk.bf16.vlgmr.msra.gmra.mrb[0].mxu0 %vm46_vm1, %v22_v5  ;;  %270 = vmatprep.subr.bf16.mxu1 %v327_v1 }
   0xa   :  { %10 = vsyncpa [#allocation3], 0  ;;  %v294_v7 = vld [vmem:[%s417_s3 + $0x18] sm:$0xff]   ;;  %v295_v8 = vld [vmem:[%s417_s3 + $0x20] sm:$0xff]   ;;  %vm203_vm2 = vcmask 130048  }
   0xb   :  { %v296_v9 = vld [vmem:[%s417_s3 + $0x28] sm:$0xff]   ;;  %v297_v10 = vld [vmem:[%s417_s3 + $0x30] sm:$0xff]   ;;  %v298_v11 = vld [vmem:[%s417_s3 + $0x38] sm:$0xff]  }
   0xc   :  { %271 = vmatpush3.bf16.msra.mxu1 %v293_v6  ;;  %v233_v12 = vld [vmem:[%s416_s2] ss:$0 sm:$0xff]  ;;  %s329_s2 = smov [#allocation2]  }
   0xd   :  { %272 = vmatprep.subr.bf16.mxu1 %v327_v1  ;;  %v237_v20 = vld [vmem:[%s418_s4] ss:$0 sm:$0xff]  ;;  %s225_s3 = sshll.u32 %s329_s2, 4  ;;  %s226_s3 = int_to_ptr.vmem [resolvable:$true] %s225_s3 }
   0xe   :  { %s303_s4 = scalar_lea.vmem %s226_s3, 128  ;;  %p308_p1 = scmp.lt.s32.totalorder %s226_s3, %s226_s3 }
   0xf   :  { %p304_p0 = scmp.ne.s32.totalorder %s226_s3, %s303_s4  ;;  %p309_p2 = scmp.lt.s32.totalorder %s303_s4, %s303_s4 }
  0x10   :  { %273 = vmatpush3.bf16.msra.mxu1 %v294_v7 }
  0x11   :  { %274 = vmatprep.subr.bf16.mxu1 %v327_v1  ;;  %p310_p3 = por %p309_p2, %p308_p1 }
  0x13   :  { %p311_p4 = pnand %p310_p3, %p304_p0 }
  0x14   :  { %275 = vmatpush3.bf16.msra.mxu1 %v295_v8 }
  0x15   :  { %276 = vmatprep.subr.bf16.mxu1 %v327_v1 }
  0x18   :  { %277 = vmatpush3.bf16.msra.mxu1 %v296_v9 }
  0x19   :  { %278 = vmatprep.subr.bf16.mxu1 %v327_v1 }
  0x1c   :  { %279 = vmatpush3.bf16.msra.mxu1 %v297_v10 }
  0x1d   :  { %280 = vmatprep.subr.bf16.mxu1 %v327_v1 }
  0x20   :  { %281 = vmatpush3.bf16.msra.mxu1 %v298_v11 }
  0xdc   :  { %v84_v13 = vpop.f32.mrb[0].mxu0 }
  0xdd   :  { %v85_v14 = vadd.f32 %v233_v12, %v84_v13  ;;  %v264_v15 = vpop.f32.mrb[1].mxu0 }
  0xde   :  { %v87_v16 = vpop.f32.mrb[2].mxu0 }
  0xdf   :  { %v90_v17 = vmax.f32 %v85_v14, 0.0  ;;  %v265_v18 = vpop.f32.mrb[3].mxu0 }
  0xe1   :  { %v91_v19 = vpack.c.bf16 %v90_v17, %v90_v17 }
  0xe3   :  { %283 = vmatmul.mubr.bf16.vlgmr.msra.gmra.mrb[0].mxu1 %v91_v19 }
 0x1b6   :  { %v197_v21 = vpop.f32.mrb[0].mxu1 }
 0x1b7   :  { %v198_v22 = vadd.f32 %v237_v20, %v197_v21  ;;  %v284_v23 = vpop.f32.mrb[1].mxu1 }
 0x1b8   :  { %v200_v24 = vpop.f32.mrb[2].mxu1 }
 0x1b9   :  { %v285_v25 = vpop.f32.mrb[3].mxu1  ;;  %v204_v26 = vsel %vm203_vm2, %v198_v22, -inf }
 0x1ba   :  { %205 = vmax.xlane.f32.xlu0 %v204_v26 }
 0x247   :  { %v206_v27 = vpop.xlane.xlu0 %205 }
 0x248   :  { %v207_v28 = vsub.f32 %v198_v22, %v206_v27 }
 0x24a   :  { %v208_v29 = vmul.f32 1.442695, %v207_v28 }
 0x24c   :  { %299 = vpow2.f32 %v208_v29 }
 0x256   :  { %v300_v30 = vpop.eup %299 }
 0x257   :  { %v210_v31 = vsel %vm203_vm2, %v300_v30, 0.0 }
 0x258   :  { %211 = vadd.xlane.f32.xlu0 %v210_v31 }
 0x2e5   :  { %v212_v32 = vpop.xlane.xlu0 %211 }
 0x2e6   :  { %301 = vrcp.f32 %v212_v32 }
 0x2f0   :  { %v302_v33 = vpop.eup %301 }
 0x2f1   :  { %v214_v34 = vmul.f32 %v302_v33, %v212_v32 }
 0x2f3   :  { %v215_v35 = vsub.f32 2.0, %v214_v34 }
 0x2f5   :  { %v216_v36 = vmul.f32 %v302_v33, %v215_v35 }
 0x2f7   :  { %v217_v37 = vmul.f32 %v300_v30, %v216_v36 }
 0x2f9   :  { %218 = vst.msk [vmem:[#allocation2] sm:$0xff] %vm203_vm2, %v217_v37 }
 0x2fa   :  { %314 = shalt.err (!%p311_p4)
}
 0x2fb   :  { %s315_s19 = scalar_lea.hbm %s419_s5, 128 }
 0x2fc   :  { %p316_p5 = scmp.ne.s32.totalorder %s419_s5, %s315_s19  ;;  %p319_p6 = scmp.lt.u32.totalorder %s315_s19, %s419_s5 }
 0x2fe   :  { %p321_p7 = pnand %p319_p6, %p316_p5 }
 0x300   :  { %324 = shalt.err (!%p321_p7)
}
 0x301   :  { %228 = dma.vmem_to_hbm [thread:$0]  %s226_s3, 128, %s419_s5, [#allocation3]  }
 0x302   :  { %325 = dma.done.wait [#allocation3], 128  }
 0x303   :  { %326 = vsyncadd [#allocation3], 4294967168 }
 0x304   :  { %232 = vsyncpa [#allocation3], 1 }

</bundles_post_ra>
